<compile_context>
chip_gen: v7x
topology: tpu7x:2x2x1
jax: 0.10.0
libtpu: 0.0.40
codegen_flags: <defaults>
</compile_context>

<pallas_src>
import functools

import jax
import jax.numpy as jnp
import numpy as np
from jax.experimental import pallas as pl
from jax.experimental.pallas import tpu as pltpu

LANES = 128
TILE_R = 4096      # rows per grid step: 4096*128*4B = 2 MiB per f32 input block
NUM_SPLITS = 2     # leading "parallel" axis -> both TCs on v7x; harmless on 1-TC chips


def _bbce_partial_kernel(x_ref, t_ref, a_out, b_out, p_out, *,
                         total_rows, steps_per_split):
    """Accumulates (8,128) f32 partial sums for this split:
         a = (1 - y) * x + softplus(-x)    (pos_weight-independent part)
         b = y * softplus(-x)              (scaled by (pos_weight - 1) in wrapper)
         p = y                             (count_pos)
    Finalize (ratio / w_neg / mean) happens in the wrapper.
    """
    c = pl.program_id(0)   # split index (maps to a TensorCore on v7x megacore)
    i = pl.program_id(1)   # step within this split (reduction axis, "arbitrary")
    tile_r, lanes = x_ref.shape

    @pl.when(i == 0)
    def _init():
        zeros = jnp.zeros((8, lanes), jnp.float32)
        a_out[...] = zeros
        b_out[...] = zeros
        p_out[...] = zeros

    x = x_ref[...].astype(jnp.float32)
    y = t_ref[...].astype(jnp.float32)

    # Numerically stable softplus(-x) = max(-x, 0) + log1p(exp(-|x|))  (exp/log1p -> EUP)
    sp = jnp.maximum(-x, 0.0) + jnp.log1p(jnp.exp(-jnp.abs(x)))
    a = x - y * x + sp          # (1 - y) * x + softplus(-x)
    b = y * sp

    def to_vreg(v):
        # (tile_r,128)->(tile_r//8,8,128) splits the sublane dim by its native tile
        # factor (layout-trivial); the axis-0 sum is pure VALU vreg adds, so only one
        # (8,128) vreg per quantity is read-modify-written per grid step.
        return v.reshape(tile_r // 8, 8, lanes).sum(axis=0)

    # Row-granular indexing: no element-index int32 overflow even for huge tensors.
    start_row = (c * steps_per_split + i) * tile_r

    @pl.when(start_row + tile_r <= total_rows)
    def _accumulate_full():
        a_out[...] += to_vreg(a)
        b_out[...] += to_vreg(b)
        p_out[...] += to_vreg(y)

    @pl.when(start_row + tile_r > total_rows)
    def _accumulate_masked():
        # Covers (a) the ragged last block and (b) clamped duplicate blocks of a split
        # that ran past the array. jnp.where is a select, so NaN/Inf from over-read
        # garbage rows cannot propagate -- do NOT "optimize" this into multiply-by-mask.
        row = start_row + jax.lax.broadcasted_iota(jnp.int32, (tile_r, lanes), 0)
        valid = row < total_rows
        zero = jnp.zeros_like(a)
        a_out[...] += to_vreg(jnp.where(valid, a, zero))
        b_out[...] += to_vreg(jnp.where(valid, b, zero))
        p_out[...] += to_vreg(jnp.where(valid, y, zero))


def _partial_sums_jax(x, y):
    """Tiny pure-JAX partials for the <128-element ragged tail."""
    x = x.astype(jnp.float32)
    y = y.astype(jnp.float32)
    sp = jnp.maximum(-x, 0.0) + jnp.log1p(jnp.exp(-jnp.abs(x)))
    return jnp.sum(x - y * x + sp), jnp.sum(y * sp), jnp.sum(y)


def _min_sublanes(dtype):
    bits = jnp.dtype(dtype).itemsize * 8
    return max(8, 256 // bits)    # 8 for 32-bit, 16 for 16-bit, 32 for 8-bit dtypes


def bbce_with_logit_loss(logits: jax.Array, target: jax.Array) -> jax.Array:
    """Forward pass of BBCEWithLogitLoss. Returns a scalar float32 loss."""
    if logits.ndim == 3:
        logits = logits[:, None, :, :]  # matches input.unsqueeze(1)
    assert logits.size == target.size, "input/target element counts must match"

    n = logits.size
    x_flat = logits.reshape(-1)   # native dtype; cast happens in-kernel
    t_flat = target.reshape(-1)

    rows = n // LANES
    n_aligned = rows * LANES
    tail = n - n_aligned

    sum_a = jnp.float32(0.0)
    sum_b = jnp.float32(0.0)
    sum_p = jnp.float32(0.0)

    if tail:
        # Ragged tail (<=127 elems): tiny pure-JAX partials; no jnp.pad of the full arrays.
        ta, tb, tp = _partial_sums_jax(x_flat[n_aligned:], t_flat[n_aligned:])
        sum_a += ta
        sum_b += tb
        sum_p += tp

    if rows:
        if tail:
            # TODO(synk): the prefix slice still copies for ragged inputs; a fully
            # zero-copy ragged path needs memory_space=pl.ANY + manual DMA.
            x2 = x_flat[:n_aligned].reshape(rows, LANES)
            t2 = t_flat[:n_aligned].reshape(rows, LANES)
        else:
            x2 = x_flat.reshape(rows, LANES)   # free bitcast, no copy
            t2 = t_flat.reshape(rows, LANES)

        min_sub = max(_min_sublanes(x2.dtype), _min_sublanes(t2.dtype))
        tile_r = min(TILE_R, ((rows + min_sub - 1) // min_sub) * min_sub)
        nblocks = pl.cdiv(rows, tile_r)
        num_splits = min(NUM_SPLITS, nblocks)
        spc = pl.cdiv(nblocks, num_splits)     # steps per split

        # Clamp the block index so a split that overruns re-reads the last real block;
        # its contribution is fully masked in-kernel (start_row >= total_rows).
        in_spec = pl.BlockSpec(
            (tile_r, LANES),
            lambda c, i: (jnp.minimum(c * spc + i, nblocks - 1), 0))
        # Per-split partial-sum block: resident across the inner axis (the accumulator).
        out_spec = pl.BlockSpec((None, 8, LANES), lambda c, i: (c, 0, 0))
        out_sds = jax.ShapeDtypeStruct((num_splits, 8, LANES), jnp.float32)

        pa, pb, pp = pl.pallas_call(
            functools.partial(_bbce_partial_kernel,
                              total_rows=rows, steps_per_split=spc),
            out_shape=(out_sds, out_sds, out_sds),
            grid_spec=pltpu.PrefetchScalarGridSpec(
                num_scalar_prefetch=0,
                grid=(num_splits, spc),
                in_specs=[in_spec, in_spec],
                out_specs=(out_spec, out_spec, out_spec)),
            compiler_params=pltpu.CompilerParams(
                dimension_semantics=("parallel", "arbitrary")),
        )(x2, t2)
        sum_a += jnp.sum(pa)
        sum_b += jnp.sum(pb)
        sum_p += jnp.sum(pp)

    # Scalar finalize (a handful of flops) in the wrapper.
    eps = 1e-10
    n_f = jnp.float32(n)
    count_pos = sum_p + eps
    count_neg = n_f - sum_p                  # sum(1 - y)
    ratio = count_neg / count_pos            # pos_weight
    w_neg = count_pos / (count_pos + count_neg)
    mean_loss = (sum_a + (ratio - 1.0) * sum_b) / n_f
    return w_neg * mean_loss


def _reference(logits, target):
    """Pure-JAX reference mirroring the PyTorch module."""
    if logits.ndim == 3:
        logits = logits[:, None, :, :]
    x = logits.astype(jnp.float32)
    y = target.astype(jnp.float32)
    eps = 1e-10
    count_pos = jnp.sum(y) + eps
    count_neg = jnp.sum(1.0 - y)
    ratio = count_neg / count_pos
    w_neg = count_pos / (count_pos + count_neg)
    sp_negx = jnp.maximum(-x, 0.0) + jnp.log1p(jnp.exp(-jnp.abs(x)))
    per_elem = (1.0 - y) * x + (1.0 + (ratio - 1.0) * y) * sp_negx
    return w_neg * jnp.mean(per_elem)


if __name__ == "__main__":
    key = jax.random.PRNGKey(0)
    k1, k2, k3, k4, k5, k6, k7, k8 = jax.random.split(key, 8)

    # 1) Primary small case: [N, C, H, W] segmentation-style logits/targets.
    N, C, H, W = 2, 4, 16, 16
    logits = jax.random.normal(k1, (N, C, H, W), dtype=jnp.float32) * 2.0
    target = jax.random.bernoulli(k2, p=0.3, shape=(N, C, H, W)).astype(jnp.float32)
    loss = jax.block_until_ready(bbce_with_logit_loss(logits, target))
    ref = jax.block_until_ready(_reference(logits, target))
    assert np.isclose(np.asarray(loss), np.asarray(ref), rtol=2e-5, atol=1e-6), (loss, ref)

    # 2) Ragged case (element count not a multiple of 128) via the 3-D unsqueeze path.
    logits2 = jax.random.normal(k3, (3, 7, 11), dtype=jnp.float32)
    target2 = jax.random.bernoulli(k4, p=0.5, shape=(3, 1, 7, 11)).astype(jnp.float32)
    loss2 = jax.block_until_ready(bbce_with_logit_loss(logits2, target2))
    ref2 = jax.block_until_ready(_reference(logits2, target2))
    assert np.isclose(np.asarray(loss2), np.asarray(ref2), rtol=2e-5, atol=1e-6), (loss2, ref2)

    # 3) Multi-block case: exercises per-split accumulation across steps, the
    #    partial-last-block mask, and the clamped duplicate block of split 1.
    logits3 = jax.random.normal(k5, (2, 4, 384, 384), dtype=jnp.float32)
    target3 = jax.random.bernoulli(k6, p=0.25, shape=(2, 4, 384, 384)).astype(jnp.float32)
    loss3 = jax.block_until_ready(bbce_with_logit_loss(logits3, target3))
    ref3 = jax.block_until_ready(_reference(logits3, target3))
    assert np.isclose(np.asarray(loss3), np.asarray(ref3), rtol=1e-4, atol=1e-6), (loss3, ref3)

    # 4) Narrow-dtype case: bf16 logits/targets streamed natively (cast in-kernel).
    logits4 = (jax.random.normal(k7, (N, C, H, W), dtype=jnp.float32) * 2.0).astype(jnp.bfloat16)
    target4 = jax.random.bernoulli(k8, p=0.4, shape=(N, C, H, W)).astype(jnp.bfloat16)
    loss4 = jax.block_until_ready(bbce_with_logit_loss(logits4, target4))
    ref4 = jax.block_until_ready(_reference(logits4, target4))
    assert np.isclose(np.asarray(loss4), np.asarray(ref4), rtol=2e-5, atol=1e-6), (loss4, ref4)

    print("KERNEL_OK")
</pallas_src>

<mosaic_0001>
module attributes {stable_mosaic.version = 11 : i64} {
  func.func @_bbce_partial_kernel(%arg0: i32, %arg1: i32, %arg2: memref<16x128xf32, #tpu.memory_space<vmem>>, %arg3: memref<16x128xf32, #tpu.memory_space<vmem>>, %arg4: memref<1x8x128xf32, #tpu.memory_space<vmem>>, %arg5: memref<1x8x128xf32, #tpu.memory_space<vmem>>, %arg6: memref<1x8x128xf32, #tpu.memory_space<vmem>>) attributes {dimension_semantics = [#tpu.dimension_semantics<parallel>, #tpu.dimension_semantics<arbitrary>], iteration_bounds = array<i64: 1, 1>, scalar_prefetch = 0 : i64, scratch_operands = 0 : i64, tpu.core_type = #tpu.core_type<tc>, window_params = [{transform_indices = @transform_0, window_bounds = array<i64: 16, 128>}, {transform_indices = @transform_1, window_bounds = array<i64: 16, 128>}, {transform_indices = @transform_2, window_bounds = array<i64: 1, 8, 128>}, {transform_indices = @transform_3, window_bounds = array<i64: 1, 8, 128>}, {transform_indices = @transform_4, window_bounds = array<i64: 1, 8, 128>}]} {
    %c0_i32 = arith.constant 0 : i32
    %0 = arith.cmpi eq, %arg1, %c0_i32 : i32
    %1 = arith.extui %0 : i1 to i32
    %c0_i32_0 = arith.constant 0 : i32
    %2 = arith.cmpi ne, %1, %c0_i32_0 : i32
    scf.if %2 {
      %cst_12 = arith.constant 0.000000e+00 : f32
      %30 = vector.broadcast %cst_12 : f32 to vector<8x128xf32>
      %c0_13 = arith.constant 0 : index
      %c0_14 = arith.constant 0 : index
      %c0_15 = arith.constant 0 : index
      %31 = vector.load %arg4[%c0_13, %c0_14, %c0_15] : memref<1x8x128xf32, #tpu.memory_space<vmem>>, vector<1x8x128xf32>
      %32 = vector.shape_cast %31 : vector<1x8x128xf32> to vector<8x128xf32>
      %33 = vector.shape_cast %30 : vector<8x128xf32> to vector<1x8x128xf32>
      tpu.vector_store %arg4[%c0_13, %c0_14, %c0_15], %33 {strides = array<i32>} : memref<1x8x128xf32, #tpu.memory_space<vmem>>, vector<1x8x128xf32>,
      %c0_16 = arith.constant 0 : index
      %c0_17 = arith.constant 0 : index
      %c0_18 = arith.constant 0 : index
      %34 = vector.load %arg5[%c0_16, %c0_17, %c0_18] : memref<1x8x128xf32, #tpu.memory_space<vmem>>, vector<1x8x128xf32>
      %35 = vector.shape_cast %34 : vector<1x8x128xf32> to vector<8x128xf32>
      %36 = vector.shape_cast %30 : vector<8x128xf32> to vector<1x8x128xf32>
      tpu.vector_store %arg5[%c0_16, %c0_17, %c0_18], %36 {strides = array<i32>} : memref<1x8x128xf32, #tpu.memory_space<vmem>>, vector<1x8x128xf32>,
      %c0_19 = arith.constant 0 : index
      %c0_20 = arith.constant 0 : index
      %c0_21 = arith.constant 0 : index
      %37 = vector.load %arg6[%c0_19, %c0_20, %c0_21] : memref<1x8x128xf32, #tpu.memory_space<vmem>>, vector<1x8x128xf32>
      %38 = vector.shape_cast %37 : vector<1x8x128xf32> to vector<8x128xf32>
      %39 = vector.shape_cast %30 : vector<8x128xf32> to vector<1x8x128xf32>
      tpu.vector_store %arg6[%c0_19, %c0_20, %c0_21], %39 {strides = array<i32>} : memref<1x8x128xf32, #tpu.memory_space<vmem>>, vector<1x8x128xf32>,
    } else {
    }
    %c0 = arith.constant 0 : index
    %c0_1 = arith.constant 0 : index
    %3 = vector.load %arg2[%c0, %c0_1] : memref<16x128xf32, #tpu.memory_space<vmem>>, vector<16x128xf32>
    %c0_2 = arith.constant 0 : index
    %c0_3 = arith.constant 0 : index
    %4 = vector.load %arg3[%c0_2, %c0_3] : memref<16x128xf32, #tpu.memory_space<vmem>>, vector<16x128xf32>
    %cst = arith.constant 0.000000e+00 : f32
    %5 = vector.broadcast %cst : f32 to vector<16x128xf32>
    %6 = arith.subf %5, %3 : vector<16x128xf32>
    %cst_4 = arith.constant 0.000000e+00 : f32
    %7 = vector.broadcast %cst_4 : f32 to vector<16x128xf32>
    %8 = arith.maximumf %6, %7 : vector<16x128xf32>
    %9 = math.absf %3 : vector<16x128xf32>
    %cst_5 = arith.constant 0.000000e+00 : f32
    %10 = vector.broadcast %cst_5 : f32 to vector<16x128xf32>
    %11 = arith.subf %10, %9 : vector<16x128xf32>
    %12 = math.exp %11 : vector<16x128xf32>
    %13 = math.log1p %12 : vector<16x128xf32>
    %14 = arith.addf %8, %13 : vector<16x128xf32>
    %15 = arith.mulf %4, %3 : vector<16x128xf32>
    %16 = arith.subf %3, %15 : vector<16x128xf32>
    %17 = arith.addf %16, %14 : vector<16x128xf32>
    %18 = arith.mulf %4, %14 : vector<16x128xf32>
    %c1_i32 = arith.constant 1 : i32
    %19 = arith.muli %arg0, %c1_i32 : i32
    %20 = arith.addi %19, %arg1 : i32
    %c16_i32 = arith.constant 16 : i32
    %21 = arith.muli %20, %c16_i32 : i32
    %c16_i32_6 = arith.constant 16 : i32
    %22 = arith.addi %21, %c16_i32_6 : i32
    %c16_i32_7 = arith.constant 16 : i32
    %23 = arith.cmpi sle, %22, %c16_i32_7 : i32
    %24 = arith.extui %23 : i1 to i32
    %c0_i32_8 = arith.constant 0 : i32
    %25 = arith.cmpi ne, %24, %c0_i32_8 : i32
    scf.if %25 {
      %c0_12 = arith.constant 0 : index
      %c0_13 = arith.constant 0 : index
      %c0_14 = arith.constant 0 : index
      %30 = vector.load %arg4[%c0_12, %c0_13, %c0_14] : memref<1x8x128xf32, #tpu.memory_space<vmem>>, vector<1x8x128xf32>
      %31 = vector.shape_cast %30 : vector<1x8x128xf32> to vector<8x128xf32>
      %32 = vector.shape_cast %17 : vector<16x128xf32> to vector<2x8x128xf32>
      %cst_15 = arith.constant dense<0.000000e+00> : vector<8x128xf32>
      %33 = vector.multi_reduction <add>, %32, %cst_15 [0] : vector<2x8x128xf32> to vector<8x128xf32>
      %34 = arith.addf %31, %33 : vector<8x128xf32>
      %c0_16 = arith.constant 0 : index
      %c0_17 = arith.constant 0 : index
      %c0_18 = arith.constant 0 : index
      %35 = vector.load %arg4[%c0_16, %c0_17, %c0_18] : memref<1x8x128xf32, #tpu.memory_space<vmem>>, vector<1x8x128xf32>
      %36 = vector.shape_cast %35 : vector<1x8x128xf32> to vector<8x128xf32>
      %37 = vector.shape_cast %34 : vector<8x128xf32> to vector<1x8x128xf32>
      tpu.vector_store %arg4[%c0_16, %c0_17, %c0_18], %37 {strides = array<i32>} : memref<1x8x128xf32, #tpu.memory_space<vmem>>, vector<1x8x128xf32>,
      %c0_19 = arith.constant 0 : index
      %c0_20 = arith.constant 0 : index
      %c0_21 = arith.constant 0 : index
      %38 = vector.load %arg5[%c0_19, %c0_20, %c0_21] : memref<1x8x128xf32, #tpu.memory_space<vmem>>, vector<1x8x128xf32>
      %39 = vector.shape_cast %38 : vector<1x8x128xf32> to vector<8x128xf32>
      %40 = vector.shape_cast %18 : vector<16x128xf32> to vector<2x8x128xf32>
      %cst_22 = arith.constant dense<0.000000e+00> : vector<8x128xf32>
      %41 = vector.multi_reduction <add>, %40, %cst_22 [0] : vector<2x8x128xf32> to vector<8x128xf32>
      %42 = arith.addf %39, %41 : vector<8x128xf32>
      %c0_23 = arith.constant 0 : index
      %c0_24 = arith.constant 0 : index
      %c0_25 = arith.constant 0 : index
      %43 = vector.load %arg5[%c0_23, %c0_24, %c0_25] : memref<1x8x128xf32, #tpu.memory_space<vmem>>, vector<1x8x128xf32>
      %44 = vector.shape_cast %43 : vector<1x8x128xf32> to vector<8x128xf32>
      %45 = vector.shape_cast %42 : vector<8x128xf32> to vector<1x8x128xf32>
      tpu.vector_store %arg5[%c0_23, %c0_24, %c0_25], %45 {strides = array<i32>} : memref<1x8x128xf32, #tpu.memory_space<vmem>>, vector<1x8x128xf32>,
      %c0_26 = arith.constant 0 : index
      %c0_27 = arith.constant 0 : index
      %c0_28 = arith.constant 0 : index
      %46 = vector.load %arg6[%c0_26, %c0_27, %c0_28] : memref<1x8x128xf32, #tpu.memory_space<vmem>>, vector<1x8x128xf32>
      %47 = vector.shape_cast %46 : vector<1x8x128xf32> to vector<8x128xf32>
      %48 = vector.shape_cast %4 : vector<16x128xf32> to vector<2x8x128xf32>
      %cst_29 = arith.constant dense<0.000000e+00> : vector<8x128xf32>
      %49 = vector.multi_reduction <add>, %48, %cst_29 [0] : vector<2x8x128xf32> to vector<8x128xf32>
      %50 = arith.addf %47, %49 : vector<8x128xf32>
      %c0_30 = arith.constant 0 : index
      %c0_31 = arith.constant 0 : index
      %c0_32 = arith.constant 0 : index
      %51 = vector.load %arg6[%c0_30, %c0_31, %c0_32] : memref<1x8x128xf32, #tpu.memory_space<vmem>>, vector<1x8x128xf32>
      %52 = vector.shape_cast %51 : vector<1x8x128xf32> to vector<8x128xf32>
      %53 = vector.shape_cast %50 : vector<8x128xf32> to vector<1x8x128xf32>
      tpu.vector_store %arg6[%c0_30, %c0_31, %c0_32], %53 {strides = array<i32>} : memref<1x8x128xf32, #tpu.memory_space<vmem>>, vector<1x8x128xf32>,
    } else {
    }
    %c16_i32_9 = arith.constant 16 : i32
    %26 = arith.addi %21, %c16_i32_9 : i32
    %c16_i32_10 = arith.constant 16 : i32
    %27 = arith.cmpi sgt, %26, %c16_i32_10 : i32
    %28 = arith.extui %27 : i1 to i32
    %c0_i32_11 = arith.constant 0 : i32
    %29 = arith.cmpi ne, %28, %c0_i32_11 : i32
    scf.if %29 {
      %30 = tpu.iota {dimensions = array<i32: 0>} : vector<16x128xi32>
      %31 = vector.broadcast %21 : i32 to vector<16x128xi32>
      %32 = arith.addi %31, %30 : vector<16x128xi32>
      %c16_i32_12 = arith.constant 16 : i32
      %33 = vector.broadcast %c16_i32_12 : i32 to vector<16x128xi32>
      %34 = arith.cmpi slt, %32, %33 : vector<16x128xi32>
      %cst_13 = arith.constant 0.000000e+00 : f32
      %35 = vector.broadcast %cst_13 : f32 to vector<16x128xf32>
      %c0_14 = arith.constant 0 : index
      %c0_15 = arith.constant 0 : index
      %c0_16 = arith.constant 0 : index
      %36 = vector.load %arg4[%c0_14, %c0_15, %c0_16] : memref<1x8x128xf32, #tpu.memory_space<vmem>>, vector<1x8x128xf32>
      %37 = vector.shape_cast %36 : vector<1x8x128xf32> to vector<8x128xf32>
      %38 = arith.select %34, %17, %35 : vector<16x128xi1>, vector<16x128xf32>
      %39 = vector.shape_cast %38 : vector<16x128xf32> to vector<2x8x128xf32>
      %cst_17 = arith.constant dense<0.000000e+00> : vector<8x128xf32>
      %40 = vector.multi_reduction <add>, %39, %cst_17 [0] : vector<2x8x128xf32> to vector<8x128xf32>
      %41 = arith.addf %37, %40 : vector<8x128xf32>
      %c0_18 = arith.constant 0 : index
      %c0_19 = arith.constant 0 : index
      %c0_20 = arith.constant 0 : index
      %42 = vector.load %arg4[%c0_18, %c0_19, %c0_20] : memref<1x8x128xf32, #tpu.memory_space<vmem>>, vector<1x8x128xf32>
      %43 = vector.shape_cast %42 : vector<1x8x128xf32> to vector<8x128xf32>
      %44 = vector.shape_cast %41 : vector<8x128xf32> to vector<1x8x128xf32>
      tpu.vector_store %arg4[%c0_18, %c0_19, %c0_20], %44 {strides = array<i32>} : memref<1x8x128xf32, #tpu.memory_space<vmem>>, vector<1x8x128xf32>,
      %c0_21 = arith.constant 0 : index
      %c0_22 = arith.constant 0 : index
      %c0_23 = arith.constant 0 : index
      %45 = vector.load %arg5[%c0_21, %c0_22, %c0_23] : memref<1x8x128xf32, #tpu.memory_space<vmem>>, vector<1x8x128xf32>
      %46 = vector.shape_cast %45 : vector<1x8x128xf32> to vector<8x128xf32>
      %47 = arith.select %34, %18, %35 : vector<16x128xi1>, vector<16x128xf32>
      %48 = vector.shape_cast %47 : vector<16x128xf32> to vector<2x8x128xf32>
      %cst_24 = arith.constant dense<0.000000e+00> : vector<8x128xf32>
      %49 = vector.multi_reduction <add>, %48, %cst_24 [0] : vector<2x8x128xf32> to vector<8x128xf32>
      %50 = arith.addf %46, %49 : vector<8x128xf32>
      %c0_25 = arith.constant 0 : index
      %c0_26 = arith.constant 0 : index
      %c0_27 = arith.constant 0 : index
      %51 = vector.load %arg5[%c0_25, %c0_26, %c0_27] : memref<1x8x128xf32, #tpu.memory_space<vmem>>, vector<1x8x128xf32>
      %52 = vector.shape_cast %51 : vector<1x8x128xf32> to vector<8x128xf32>
      %53 = vector.shape_cast %50 : vector<8x128xf32> to vector<1x8x128xf32>
      tpu.vector_store %arg5[%c0_25, %c0_26, %c0_27], %53 {strides = array<i32>} : memref<1x8x128xf32, #tpu.memory_space<vmem>>, vector<1x8x128xf32>,
      %c0_28 = arith.constant 0 : index
      %c0_29 = arith.constant 0 : index
      %c0_30 = arith.constant 0 : index
      %54 = vector.load %arg6[%c0_28, %c0_29, %c0_30] : memref<1x8x128xf32, #tpu.memory_space<vmem>>, vector<1x8x128xf32>
      %55 = vector.shape_cast %54 : vector<1x8x128xf32> to vector<8x128xf32>
      %56 = arith.select %34, %4, %35 : vector<16x128xi1>, vector<16x128xf32>
      %57 = vector.shape_cast %56 : vector<16x128xf32> to vector<2x8x128xf32>
      %cst_31 = arith.constant dense<0.000000e+00> : vector<8x128xf32>
      %58 = vector.multi_reduction <add>, %57, %cst_31 [0] : vector<2x8x128xf32> to vector<8x128xf32>
      %59 = arith.addf %55, %58 : vector<8x128xf32>
      %c0_32 = arith.constant 0 : index
      %c0_33 = arith.constant 0 : index
      %c0_34 = arith.constant 0 : index
      %60 = vector.load %arg6[%c0_32, %c0_33, %c0_34] : memref<1x8x128xf32, #tpu.memory_space<vmem>>, vector<1x8x128xf32>
      %61 = vector.shape_cast %60 : vector<1x8x128xf32> to vector<8x128xf32>
      %62 = vector.shape_cast %59 : vector<8x128xf32> to vector<1x8x128xf32>
      tpu.vector_store %arg6[%c0_32, %c0_33, %c0_34], %62 {strides = array<i32>} : memref<1x8x128xf32, #tpu.memory_space<vmem>>, vector<1x8x128xf32>,
    } else {
    }
    return
  }
  func.func @transform_0(%arg0: i32, %arg1: i32) -> (i32, i32) {
    %c1_i32 = arith.constant 1 : i32
    %0 = arith.muli %arg0, %c1_i32 : i32
    %1 = arith.addi %0, %arg1 : i32
    %c0_i32 = arith.constant 0 : i32
    %2 = arith.minsi %1, %c0_i32 : i32
    %c0_i32_0 = arith.constant 0 : i32
    %c0_i32_1 = arith.constant 0 : i32
    return %2, %c0_i32_0 : i32, i32
  }
  func.func @transform_1(%arg0: i32, %arg1: i32) -> (i32, i32) {
    %c1_i32 = arith.constant 1 : i32
    %0 = arith.muli %arg0, %c1_i32 : i32
    %1 = arith.addi %0, %arg1 : i32
    %c0_i32 = arith.constant 0 : i32
    %2 = arith.minsi %1, %c0_i32 : i32
    %c0_i32_0 = arith.constant 0 : i32
    %c0_i32_1 = arith.constant 0 : i32
    return %2, %c0_i32_0 : i32, i32
  }
  func.func @transform_2(%arg0: i32, %arg1: i32) -> (i32, i32, i32) {
    %c0_i32 = arith.constant 0 : i32
    %c0_i32_0 = arith.constant 0 : i32
    %c0_i32_1 = arith.constant 0 : i32
    return %arg0, %c0_i32, %c0_i32_0 : i32, i32, i32
  }
  func.func @transform_3(%arg0: i32, %arg1: i32) -> (i32, i32, i32) {
    %c0_i32 = arith.constant 0 : i32
    %c0_i32_0 = arith.constant 0 : i32
    %c0_i32_1 = arith.constant 0 : i32
    return %arg0, %c0_i32, %c0_i32_0 : i32, i32, i32
  }
  func.func @transform_4(%arg0: i32, %arg1: i32) -> (i32, i32, i32) {
    %c0_i32 = arith.constant 0 : i32
    %c0_i32_0 = arith.constant 0 : i32
    %c0_i32_1 = arith.constant 0 : i32
    return %arg0, %c0_i32, %c0_i32_0 : i32, i32, i32
  }
}

</mosaic_0001>

<bundles_post_ra>
// kernel: tpu_custom_call.1
= control target key start
LH: loop header
LB: loop body
LE: loop exit
PB: predicated region body
PF: predicated region fallthrough
CT: control target
= control target key end

     0   :  { %10 = vsyncpa [#allocation3], 0  ;;  %s451_s0 = inlined_call_operand.hbm [shape: f32[16,128], index: 0, kind: input, shape index: {}]   ;;  %s452_s1 = inlined_call_operand.hbm [shape: f32[16,128], index: 1, kind: input, shape index: {}]   ;;  %s453_s2 = inlined_call_operand.hbm [shape: f32[1,8,128], index: 2, kind: output, shape index: {0}]   ;;  %s454_s3 = inlined_call_operand.hbm [shape: f32[1,8,128], index: 3, kind: output, shape index: {1}]   ;;  %s455_s4 = inlined_call_operand.hbm [shape: f32[1,8,128], index: 4, kind: output, shape index: {2}]  }
   0x1   :  { %11 = vsyncpa [#allocation6], 0 }
   0x2   :  { %12 = vsyncpa [#allocation4], 0 }
   0x3   :  { %13 = vsyncpa [#allocation9], 0  ;;  %s345_s15 = smov [#allocation2]   ;;  %s227_s19 = scalar_lea.hbm %s451_s0, 256 }
   0x4   :  { %s25_s16 = sshll.u32 %s345_s15, 4  ;;  %p228_p0 = scmp.ne.s32.totalorder %s451_s0, %s227_s19  ;;  %s26_s16 = int_to_ptr.vmem [resolvable:$true] %s25_s16 }
   0x5   :  { %p231_p1 = scmp.lt.u32.totalorder %s227_s19, %s451_s0 }
   0x7   :  { %p233_p2 = pnand %p231_p1, %p228_p0 }
   0x9   :  { %236 = shalt.err (!%p233_p2)
}
   0xa   :  { %s237_s24 = scalar_lea.vmem %s26_s16, 256  ;;  %p242_p4 = scmp.lt.s32.totalorder %s26_s16, %s26_s16 }
   0xb   :  { %p238_p3 = scmp.ne.s32.totalorder %s26_s16, %s237_s24  ;;  %p243_p5 = scmp.lt.s32.totalorder %s237_s24, %s237_s24 }
   0xd   :  { %p244_p6 = por %p243_p5, %p242_p4 }
   0xf   :  { %p245_p7 = pnand %p244_p6, %p238_p3 }
  0x11   :  { %248 = shalt.err (!%p245_p7)
}
  0x12   :  { %s346_s25 = smov 128   ;;  %s347_s26 = smov 8  }
  0x13   :  { %31 = dma.hbm_to_vmem [thread:$0]  %s451_s0, 256, %s26_s16, [#allocation3], %s346_s25, %s346_s25, %s347_s26  }
  0x14   :  { %s348_s29 = smov [#allocation5]   ;;  %s249_s7 = scalar_lea.hbm %s452_s1, 256 }
  0x15   :  { %s43_s30 = sshll.u32 %s348_s29, 4  ;;  %p250_p8 = scmp.ne.s32.totalorder %s452_s1, %s249_s7  ;;  %s44_s30 = int_to_ptr.vmem [resolvable:$true] %s43_s30 }
  0x16   :  { %p253_p9 = scmp.lt.u32.totalorder %s249_s7, %s452_s1 }
  0x18   :  { %p255_p10 = pnand %p253_p9, %p250_p8 }
  0x1a   :  { %258 = shalt.err (!%p255_p10)
}
  0x1b   :  { %s259_s12 = scalar_lea.vmem %s44_s30, 256  ;;  %p264_p12 = scmp.lt.s32.totalorder %s44_s30, %s44_s30 }
  0x1c   :  { %p260_p11 = scmp.ne.s32.totalorder %s44_s30, %s259_s12  ;;  %p265_p13 = scmp.lt.s32.totalorder %s259_s12, %s259_s12 }
  0x1e   :  { %p266_p0 = por %p265_p13, %p264_p12 }
  0x20   :  { %p267_p1 = pnand %p266_p0, %p260_p11 }
  0x22   :  { %270 = shalt.err (!%p267_p1)
}
  0x23   :  { %49 = dma.hbm_to_vmem [thread:$0]  %s452_s1, 256, %s44_s30, [#allocation6], %s346_s25, %s346_s25, %s347_s26  }
  0x24   :  { %337 = dma.done.wait [#allocation3], 256  }
  0x25   :  { %338 = vsyncadd [#allocation3], 4294967040 }
  0x26   :  { %339 = dma.done.wait [#allocation6], 256  }
  0x27   :  { %340 = vsyncadd [#allocation6], 4294967040  ;;  %v71_v0 = vld [vmem:[#allocation2] sm:$0xff]  ;;  %v72_v1 = vld [vmem:[#allocation2 + $0x8] sm:$0xff]  ;;  %s349_s1 = smov [#allocation8]   ;;  %s350_s15 = smov [#allocation7]  }
  0x28   :  { %v73_v2 = vld [vmem:[#allocation5] sm:$0xff]  ;;  %v74_v3 = vld [vmem:[#allocation5 + $0x8] sm:$0xff]  ;;  %v79_v4 = vand.u32 2147483647, %v71_v0  ;;  %v80_v5 = vand.u32 2147483647, %v72_v1 }
  0x29   :  { %v131_v6 = vadd.f32 %v74_v3, %v73_v2  ;;  %v75_v18 = vsub.f32 0.0, %v71_v0  ;;  %v76_v21 = vsub.f32 0.0, %v72_v1  ;;  %v107_v23 = vmul.f32 %v73_v2, %v71_v0  ;;  %s180_s14 = sshll.u32 %s349_s1, 4  ;;  %s170_s16 = sshll.u32 %s350_s15, 4  ;;  %s181_s14 = int_to_ptr.vmem [resolvable:$true] %s180_s14  ;;  %s401_s16 = int_to_ptr.vmem [resolvable:$true] %s170_s16 }
  0x2a   :  { %v81_v7 = vsub.f32 0.0, %v79_v4  ;;  %v82_v8 = vsub.f32 0.0, %v80_v5  ;;  %v108_v25 = vmul.f32 %v74_v3, %v72_v1  ;;  %s351_s17 = smov [#allocation10]   ;;  %s271_s19 = scalar_lea.vmem %s181_s14, 128 }
  0x2b   :  { %133 = vst [vmem:[#allocation10] sm:$0xff] %v131_v6  ;;  %v77_v27 = vmax.f32 %v75_v18, 0.0  ;;  %v78_v30 = vmax.f32 %v76_v21, 0.0  ;;  %v109_v33 = vsub.f32 %v71_v0, %v107_v23  ;;  %s190_s18 = sshll.u32 %s351_s17, 4  ;;  %p272_p2 = scmp.ne.s32.totalorder %s181_s14, %s271_s19  ;;  %s403_s18 = int_to_ptr.vmem [resolvable:$true] %s190_s18 }
  0x2c   :  { %v83_v9 = vmul.f32 1.442695, %v81_v7  ;;  %v85_v10 = vmul.f32 1.442695, %v82_v8  ;;  %v110_v35 = vsub.f32 %v72_v1, %v108_v25  ;;  %p276_p3 = scmp.lt.s32.totalorder %s181_s14, %s181_s14  ;;  %p277_p4 = scmp.lt.s32.totalorder %s271_s19, %s271_s19 }
  0x2e   :  { %219 = vpow2.f32 %v83_v9  ;;  %p278_p5 = por %p277_p4, %p276_p3 }
  0x2f   :  { %221 = vpow2.f32 %v85_v10 }
  0x30   :  { %p279_p6 = pnand %p278_p5, %p272_p2 }
  0x38   :  { %v220_v11 = vpop.eup %219 }
  0x39   :  { %v222_v12 = vpop.eup %221  ;;  %v87_v13 = vadd.f32 1.0, %v220_v11  ;;  %v90_v15 = vmul.f32 -0.5, %v220_v11  ;;  %v93_v19 = vand.u32 2147483647, %v220_v11 }
  0x3a   :  { %v96_v14 = vadd.f32 1.0, %v222_v12  ;;  %v99_v16 = vmul.f32 -0.5, %v222_v12  ;;  %v102_v22 = vand.u32 2147483647, %v222_v12 }
  0x3b   :  { %223 = vlog2.f32 %v87_v13  ;;  %v91_v17 = vadd.f32 1.0, %v90_v15  ;;  %vm94_vm0 = vcmp.lt.f32.partialorder %v93_v19, 0.0004427343 }
  0x3c   :  { %225 = vlog2.f32 %v96_v14  ;;  %v100_v20 = vadd.f32 1.0, %v99_v16  ;;  %vm103_vm1 = vcmp.lt.f32.partialorder %v102_v22, 0.0004427343 }
  0x3d   :  { %v92_v24 = vmul.f32 %v220_v11, %v91_v17 }
  0x3e   :  { %v101_v28 = vmul.f32 %v222_v12, %v100_v20 }
  0x45   :  { %v224_v26 = vpop.eup %223 }
  0x46   :  { %v226_v29 = vpop.eup %225  ;;  %v89_v31 = vmul.f32 0.6931472, %v224_v26 }
  0x47   :  { %v98_v32 = vmul.f32 0.6931472, %v226_v29 }
  0x48   :  { %v95_v34 = vsel %vm94_vm0, %v92_v24, %v89_v31 }
  0x49   :  { %v104_v36 = vsel %vm103_vm1, %v101_v28, %v98_v32  ;;  %v105_v37 = vadd.f32 %v95_v34, %v77_v27 }
  0x4a   :  { %v106_v38 = vadd.f32 %v104_v36, %v78_v30 }
  0x4b   :  { %v113_v39 = vmul.f32 %v105_v37, %v73_v2  ;;  %v111_v40 = vadd.f32 %v109_v33, %v105_v37 }
  0x4c   :  { %v114_v41 = vmul.f32 %v106_v38, %v74_v3  ;;  %v112_v42 = vadd.f32 %v110_v35, %v106_v38 }
  0x4e   :  { %v127_v43 = vadd.f32 %v114_v41, %v113_v39  ;;  %v123_v44 = vadd.f32 %v112_v42, %v111_v40 }
  0x50   :  { %129 = vst [vmem:[#allocation8] sm:$0xff] %v127_v43  ;;  %125 = vst [vmem:[#allocation7] sm:$0xff] %v123_v44 }
  0x51   :  { %282 = shalt.err (!%p279_p6)
}
  0x52   :  { %s283_s22 = scalar_lea.hbm %s454_s3, 128 }
  0x53   :  { %p284_p7 = scmp.ne.s32.totalorder %s454_s3, %s283_s22  ;;  %p287_p8 = scmp.lt.u32.totalorder %s283_s22, %s454_s3 }
  0x55   :  { %p289_p9 = pnand %p287_p8, %p284_p7 }
  0x57   :  { %292 = shalt.err (!%p289_p9)
}
  0x58   :  { %183 = dma.vmem_to_hbm [thread:$0]  %s181_s14, 128, %s454_s3, [#allocation9]  }
  0x59   :  { %s293_s29 = scalar_lea.vmem %s401_s16, 128  ;;  %p298_p11 = scmp.lt.s32.totalorder %s401_s16, %s401_s16 }
  0x5a   :  { %p294_p10 = scmp.ne.s32.totalorder %s401_s16, %s293_s29  ;;  %p299_p12 = scmp.lt.s32.totalorder %s293_s29, %s293_s29 }
  0x5c   :  { %p300_p13 = por %p299_p12, %p298_p11 }
  0x5e   :  { %p301_p0 = pnand %p300_p13, %p294_p10 }
  0x60   :  { %304 = shalt.err (!%p301_p0)
}
  0x61   :  { %s305_s6 = scalar_lea.hbm %s453_s2, 128 }
  0x62   :  { %p306_p1 = scmp.ne.s32.totalorder %s453_s2, %s305_s6  ;;  %p309_p2 = scmp.lt.u32.totalorder %s305_s6, %s453_s2 }
  0x64   :  { %p311_p3 = pnand %p309_p2, %p306_p1 }
  0x66   :  { %314 = shalt.err (!%p311_p3)
}
  0x67   :  { %173 = dma.vmem_to_hbm [thread:$0]  %s401_s16, 128, %s453_s2, [#allocation4]  }
  0x68   :  { %s315_s12 = scalar_lea.vmem %s403_s18, 128  ;;  %p320_p5 = scmp.lt.s32.totalorder %s403_s18, %s403_s18 }
  0x69   :  { %p316_p4 = scmp.ne.s32.totalorder %s403_s18, %s315_s12  ;;  %p321_p6 = scmp.lt.s32.totalorder %s315_s12, %s315_s12 }
  0x6b   :  { %p322_p7 = por %p321_p6, %p320_p5 }
  0x6d   :  { %p323_p8 = pnand %p322_p7, %p316_p4 }
  0x6f   :  { %326 = shalt.err (!%p323_p8)
}
  0x70   :  { %s327_s1 = scalar_lea.hbm %s455_s4, 128 }
  0x71   :  { %p328_p9 = scmp.ne.s32.totalorder %s455_s4, %s327_s1  ;;  %p331_p10 = scmp.lt.u32.totalorder %s327_s1, %s455_s4 }
  0x73   :  { %p333_p11 = pnand %p331_p10, %p328_p9 }
  0x75   :  { %336 = shalt.err (!%p333_p11)
}
  0x76   :  { %193 = dma.vmem_to_hbm [thread:$0]  %s403_s18, 128, %s455_s4, [#allocation9]  }
  0x77   :  { %341 = dma.done.wait [#allocation4], 128  }
  0x78   :  { %342 = vsyncadd [#allocation4], 4294967168 }
  0x79   :  { %343 = dma.done.wait [#allocation9], 256  }
  0x7a   :  { %344 = vsyncadd [#allocation9], 4294967040 }
  0x7b   :  { %203 = vsyncpa [#allocation3], 1 }
  0x7c   :  { %204 = vsyncpa [#allocation6], 1 }
  0x7d   :  { %205 = vsyncpa [#allocation4], 1 }
  0x7e   :  { %206 = vsyncpa [#allocation9], 1 }

</bundles_post_ra>
